<compile_context>
chip_gen: v7x
topology: tpu7x:2x2x1
jax: 0.10.0
libtpu: 0.0.40
codegen_flags: <defaults>
</compile_context>

<pallas_src>
import jax
import jax.numpy as jnp
from jax.experimental import pallas as pl
from jax.experimental.pallas import tpu as pltpu

_LANE = 128
_SUBLANE = 8


def _round_up(x, m):
    return (x + m - 1) // m * m


def _vmem_capacity_bytes():
    try:
        return int(pltpu.get_tpu_info().vmem_capacity_bytes)
    except Exception:
        # Conservative fallback: v7x has the smallest per-core VMEM (64 MiB).
        return 64 * 1024 * 1024


def _pick_tiling(m_rows, k_cols, p_cols, x_itemsize):
    """Row-tile size and scoped-VMEM limit for the streaming matvec.

    Uses padded per-row VMEM cost (last dims lane-padded to 128) so the
    double-buffered footprint estimate is honest, targets multi-MiB tiles
    (HBM roofline needs them), and keeps >= ~8 grid steps when the input is
    large enough (pipeline overlap + 2-TensorCore sharding on v7x).
    """
    phys = _vmem_capacity_bytes()
    k_pad = _round_up(k_cols, _LANE)
    p_pad = _round_up(p_cols, _LANE)
    # One logical row costs one padded x row + one padded f32 output row.
    row_bytes = k_pad * x_itemsize + p_pad * 4
    w_bytes = _round_up(k_cols, _SUBLANE) * p_pad * 4          # resident weight block
    margin = 4 * 1024 * 1024                                    # compiler scratch slack

    # Per-buffer tile budget: ~8 MiB, but never more than 1/8 of physical VMEM
    # (double-buffered x+out = 4 buffers => <= ~1/2 of VMEM before the cap).
    tile_budget = min(8 * 1024 * 1024, phys // 8)
    rows = max(_SUBLANE, (tile_budget // max(1, row_bytes)) // _SUBLANE * _SUBLANE)

    # Keep >= 8 grid steps when there is enough work; shrink the tile rather
    # than collapsing to 1-2 steps (kills overlap / megacore sharding).
    min_steps = 8
    if m_rows >= min_steps * 2 * _SUBLANE:
        rows = min(rows, _round_up(pl.cdiv(m_rows, min_steps), _SUBLANE))
    if rows >= m_rows:
        rows = m_rows                                           # single full block

    cap = phys * 3 // 4
    rows_pad = _round_up(rows, _SUBLANE)
    need = 2 * rows_pad * row_bytes + 2 * w_bytes + margin
    while need > cap and rows > _SUBLANE:                       # safety for huge C
        rows = max(_SUBLANE, (rows // 2) // _SUBLANE * _SUBLANE)
        rows_pad = _round_up(rows, _SUBLANE)
        need = 2 * rows_pad * row_bytes + 2 * w_bytes + margin

    vmem_limit = int(min(max(need, 32 * 1024 * 1024), cap))
    return rows, vmem_limit


def _linear_tile_kernel(x_ref, w_ref, b_ref, o_ref):
    # x_ref: (tile_m, K) native dtype (VMEM)
    # w_ref: (1, C) f32 [unpacked]  OR  (k*C, k) f32 block-diagonal [packed]
    # b_ref: (1,) f32 (SMEM scalar)
    # o_ref: (tile_m, P) f32
    x = x_ref[...].astype(jnp.float32)
    w = w_ref[...]
    if w.shape[0] == 1:
        # 1-output-column matvec: VPU multiply + XLU lane reduce (exact f32,
        # avoids burning the MXU at 1/128 output-lane utilization).
        acc = jnp.sum(x * w, axis=-1, keepdims=True)
    else:
        # Lane-packed small-C path: one MXU matmul against the block-diagonal
        # weight performs the per-segment reduction (plenty of MXU slack in
        # this HBM-bound kernel).
        acc = jnp.dot(x, w, preferred_element_type=jnp.float32)
    o_ref[...] = (acc + b_ref[0]).astype(o_ref.dtype)


def _call_linear(x2d, w_mat, bias, out_cols):
    """Row-tiled, auto-pipelined  x2d @ w_mat + bias  (f32 output)."""
    M, K = x2d.shape
    itemsize = jnp.dtype(x2d.dtype).itemsize
    tile_m, vmem_limit = _pick_tiling(M, K, out_cols, itemsize)
    grid = (pl.cdiv(M, tile_m),)
    return pl.pallas_call(
        _linear_tile_kernel,
        out_shape=jax.ShapeDtypeStruct((M, out_cols), jnp.float32),
        grid=grid,
        in_specs=[
            pl.BlockSpec((tile_m, K), lambda i: (i, 0)),        # streamed x tile
            pl.BlockSpec(tuple(w_mat.shape), lambda i: (0, 0)),  # resident weight
            pl.BlockSpec(memory_space=pltpu.MemorySpace.SMEM),  # bias scalar
        ],
        out_specs=pl.BlockSpec((tile_m, out_cols), lambda i: (i, 0)),
        compiler_params=pltpu.CompilerParams(
            dimension_semantics=("parallel",),
            vmem_limit_bytes=vmem_limit,
        ),
        cost_estimate=pl.CostEstimate(
            flops=2 * M * K * out_cols,
            transcendentals=0,
            bytes_accessed=M * K * itemsize + M * out_cols * 4 + K * out_cols * 4,
        ),
    )(x2d, w_mat, bias)


def nos_linear_pallas(x_flat, weight, bias):
    """Compute x_flat @ weight.T + bias (the nn.Linear(in_channels, 1)).

    x_flat: (N, C) any float dtype (upcast to f32 inside the kernel)
    weight: (1, C) / (C,) Linear weight;  bias: (1,) Linear bias
    returns: (N, 1) float32
    """
    N, C = x_flat.shape
    w_row = weight.reshape(1, -1).astype(jnp.float32)           # (1, C)
    b = bias.reshape(1).astype(jnp.float32)                     # (1,)
    if N == 0:
        return jnp.zeros((0, 1), jnp.float32)

    # Lane-pack small C: fold k consecutive boxes into one ~128-lane row.
    k = _LANE // C if 0 < C <= _LANE // 2 else 1
    if k > 1 and N // k < 8:
        k = 1                                                   # not worth it for tiny N
    n_main = (N // k) * k
    m = n_main // k

    outs = []
    if m > 0:
        if k > 1:
            x_main = x_flat[:n_main].reshape(m, k * C)          # free row-major reshape
            # Block-diagonal weight: column j reduces segment j of a packed row.
            w_mat = jnp.kron(jnp.eye(k, dtype=jnp.float32), w_row.T)   # (k*C, k)
        else:
            x_main = x_flat
            w_mat = w_row                                       # (1, C)
        out_main = _call_linear(x_main, w_mat, b, out_cols=k)
        outs.append(out_main.reshape(n_main, 1))
    if n_main < N:
        # Ragged tail (< k rows): plain XLA matvec; avoids an HBM copy of x.
        tail = x_flat[n_main:].astype(jnp.float32)
        outs.append(tail @ w_row.T + b)
    return outs[0] if len(outs) == 1 else jnp.concatenate(outs, axis=0)


def nos_predictor_forward(x, nos_proposals, weight, bias):
    """JAX/Pallas equivalent of nos_predictor.forward.

    x: (N, C) or (N, C, 1, 1); nos_proposals: per-image containers (only len()
    is used); weight: (1, C); bias: (1,).  Returns a tuple of (boxes_i, 1).
    """
    if x.ndim == 4:
        assert tuple(x.shape[2:]) == (1, 1)
    x_flat = x.reshape(x.shape[0], -1)                          # flatten(start_dim=1)
    nos = nos_linear_pallas(x_flat, weight, bias)
    boxes_per_image = [len(l) for l in nos_proposals]
    # torch.split(dim=0) equivalent — pure Python glue on the (N, 1) output.
    nos_list = []
    start = 0
    for n in boxes_per_image:
        nos_list.append(nos[start:start + n])
        start += n
    return tuple(nos_list)


if __name__ == "__main__":
    key = jax.random.PRNGKey(0)
    keys = jax.random.split(key, 8)

    def randq(k, shape, scale=1.0, dtype=jnp.float32):
        # Integer/quarter-valued test data: exactly representable in bf16/f32,
        # so the checks are independent of the MXU's f32 pass decomposition.
        return (jax.random.randint(k, shape, -3, 4).astype(jnp.float32) * scale).astype(dtype)

    # --- case 1: module-shaped input (N, C, 1, 1), two images with 3 + 5 boxes
    in_channels = 16
    nos_proposals = [list(range(3)), list(range(5))]
    n_boxes = sum(len(p) for p in nos_proposals)
    x = randq(keys[0], (n_boxes, in_channels, 1, 1))
    weight = randq(keys[1], (1, in_channels), scale=0.25)
    bias = randq(keys[2], (1,), scale=0.25)

    nos_list = jax.block_until_ready(
        nos_predictor_forward(x, nos_proposals, weight, bias))
    got = jnp.concatenate(nos_list, axis=0)
    ref = x.reshape(n_boxes, -1) @ weight.T + bias
    assert nos_list[0].shape == (3, 1) and nos_list[1].shape == (5, 1)
    assert jnp.allclose(got, ref, atol=1e-5)

    # --- case 2: large-C unpacked path, multi-tile grid with a ragged edge tile
    n2, c2 = 1040, 256
    x2 = randq(keys[3], (n2, c2))
    w2 = randq(keys[4], (1, c2), scale=0.25)
    b2 = randq(keys[5], (1,), scale=0.25)
    out2 = jax.block_until_ready(nos_linear_pallas(x2, w2, b2))
    assert out2.shape == (n2, 1)
    assert jnp.allclose(out2, x2 @ w2.T + b2, atol=1e-4)

    # --- case 3: small-C lane-packed path (bf16 input) with a ragged packing tail
    n3, c3 = 1037, 16
    x3 = randq(keys[6], (n3, c3), dtype=jnp.bfloat16)
    w3 = randq(keys[7], (1, c3), scale=0.25)
    b3 = randq(keys[2], (1,), scale=0.25)
    out3 = jax.block_until_ready(nos_linear_pallas(x3, w3, b3))
    ref3 = x3.astype(jnp.float32) @ w3.T + b3
    assert out3.shape == (n3, 1)
    assert jnp.allclose(out3, ref3, atol=1e-4)

    print("KERNEL_OK")
</pallas_src>

<mosaic_0001>
module attributes {stable_mosaic.version = 11 : i64} {
  func.func @_linear_tile_kernel(%arg0: i32, %arg1: memref<8x16xf32, #tpu.memory_space<vmem>>, %arg2: memref<1x16xf32, #tpu.memory_space<vmem>>, %arg3: memref<1xf32, #tpu.memory_space<smem>>, %arg4: memref<8x1xf32, #tpu.memory_space<vmem>>) attributes {dimension_semantics = [#tpu.dimension_semantics<parallel>], iteration_bounds = array<i64: 1>, scalar_prefetch = 0 : i64, scratch_operands = 0 : i64, tpu.core_type = #tpu.core_type<tc>, window_params = [{transform_indices = @transform_0, window_bounds = array<i64: 8, 16>}, {pipeline_mode = #tpu.pipeline_mode<synchronous>, transform_indices = @transform_1, window_bounds = array<i64: 1, 16>}, {transform_indices = @transform_2, window_bounds = array<i64: 1>}, {transform_indices = @transform_3, window_bounds = array<i64: 8, 1>}]} {
    %c0 = arith.constant 0 : index
    %c0_0 = arith.constant 0 : index
    %0 = vector.load %arg1[%c0, %c0_0] : memref<8x16xf32, #tpu.memory_space<vmem>>, vector<8x16xf32>
    %c0_1 = arith.constant 0 : index
    %c0_2 = arith.constant 0 : index
    %1 = vector.load %arg2[%c0_1, %c0_2] : memref<1x16xf32, #tpu.memory_space<vmem>>, vector<1x16xf32>
    %2 = vector.broadcast %1 : vector<1x16xf32> to vector<8x16xf32>
    %3 = arith.mulf %0, %2 : vector<8x16xf32>
    %cst = arith.constant dense<0.000000e+00> : vector<8xf32>
    %4 = vector.multi_reduction <add>, %3, %cst [1] : vector<8x16xf32> to vector<8xf32>
    %5 = vector.shape_cast %4 : vector<8xf32> to vector<8x1xf32>
    %c0_3 = arith.constant 0 : index
    %6 = memref.load %arg3[%c0_3] : memref<1xf32, #tpu.memory_space<smem>>
    %7 = vector.broadcast %6 : f32 to vector<8x1xf32>
    %8 = arith.addf %5, %7 : vector<8x1xf32>
    %c0_4 = arith.constant 0 : index
    %c0_5 = arith.constant 0 : index
    %9 = vector.load %arg4[%c0_4, %c0_5] : memref<8x1xf32, #tpu.memory_space<vmem>>, vector<8x1xf32>
    tpu.vector_store %arg4[%c0_4, %c0_5], %8 {strides = array<i32>} : memref<8x1xf32, #tpu.memory_space<vmem>>, vector<8x1xf32>,
    return
  }
  func.func @transform_0(%arg0: i32) -> (i32, i32) {
    %c0_i32 = arith.constant 0 : i32
    %c0_i32_0 = arith.constant 0 : i32
    return %arg0, %c0_i32 : i32, i32
  }
  func.func @transform_1(%arg0: i32) -> (i32, i32) {
    %c0_i32 = arith.constant 0 : i32
    %c0_i32_0 = arith.constant 0 : i32
    %c0_i32_1 = arith.constant 0 : i32
    return %c0_i32, %c0_i32_0 : i32, i32
  }
  func.func @transform_2(%arg0: i32) -> i32 {
    %c0_i32 = arith.constant 0 : i32
    %c0_i32_0 = arith.constant 0 : i32
    return %c0_i32 : i32
  }
  func.func @transform_3(%arg0: i32) -> (i32, i32) {
    %c0_i32 = arith.constant 0 : i32
    %c0_i32_0 = arith.constant 0 : i32
    return %arg0, %c0_i32 : i32, i32
  }
}

</mosaic_0001>

<bundles_post_ra>
// kernel: tpu_custom_call.1
= control target key start
LH: loop header
LB: loop body
LE: loop exit
PB: predicated region body
PF: predicated region fallthrough
CT: control target
= control target key end

     0   :  { %9 = vsyncpa [#allocation4], 0  ;;  %s76_s12 = smov [#allocation3]   ;;  %s118_s0 = inlined_call_operand.hbm [shape: f32[8,16], index: 0, kind: input, shape index: {}]   ;;  %s119_s1 = inlined_call_operand.vmem [shape: f32[1,16], index: 1, kind: input, shape index: {}]   ;;  %s120_s2 = inlined_call_operand.<no memory space> [shape: f32[1], index: 2, kind: input, shape index: {}]   ;;  %s121_s3 = inlined_call_operand.vmem [shape: f32[8,1], index: 3, kind: output, shape index: {}]  }
   0x1   :  { %s16_s13 = sshll.u32 %s76_s12, 4  ;;  %s52_s16 = scalar_lea.hbm %s118_s0, 128  ;;  %s17_s13 = int_to_ptr.vmem [resolvable:$true] %s16_s13 }
   0x2   :  { %p53_p0 = scmp.ne.s32.totalorder %s118_s0, %s52_s16  ;;  %p56_p1 = scmp.lt.u32.totalorder %s52_s16, %s118_s0 }
   0x4   :  { %p58_p2 = pnand %p56_p1, %p53_p0 }
   0x6   :  { %61 = shalt.err (!%p58_p2)
}
   0x7   :  { %s62_s21 = scalar_lea.vmem %s17_s13, 128  ;;  %p67_p4 = scmp.lt.s32.totalorder %s17_s13, %s17_s13 }
   0x8   :  { %p63_p3 = scmp.ne.s32.totalorder %s17_s13, %s62_s21  ;;  %p68_p5 = scmp.lt.s32.totalorder %s62_s21, %s62_s21 }
   0xa   :  { %p69_p6 = por %p68_p5, %p67_p4 }
   0xc   :  { %p70_p7 = pnand %p69_p6, %p63_p3 }
   0xe   :  { %73 = shalt.err (!%p70_p7)
}
   0xf   :  { %19 = dma.hbm_to_vmem [thread:$0]  %s118_s0, 128, %s17_s13, [#allocation4]  }
  0x10   :  { %74 = dma.done.wait [#allocation4], 128  }
  0x11   :  { %75 = vsyncadd [#allocation4], 4294967168  ;;  %v27_v0 = vld [vmem:[#allocation3] sm:$0xff]  ;;  %vm36_vm0 = vcmask 130048   ;;  %v41_v4 = vstv %s120_s2  ;;  %vm43_vm1 = vcmask 7168  }
  0x12   :  { %v50_v1 = vld [vmem:[%s119_s1] ss:$0 sm:$0xff] }
  0x13   :  { %v35_v2 = vmul.f32 %v50_v1, %v27_v0 }
  0x15   :  { %v37_v3 = vsel %vm36_vm0, %v35_v2, 0.0 }
  0x16   :  { %38 = vadd.xlane.f32.xlu0 %v37_v3 }
  0xa3   :  { %v39_v5 = vpop.xlane.xlu0 %38 }
  0xa4   :  { %v42_v6 = vadd.f32 %v41_v4, %v39_v5 }
  0xa6   :  { %44 = vst.msk [vmem:[%s121_s3] sm:$0xff] %vm43_vm1, %v42_v6 }
  0xa7   :  { %49 = vsyncpa [#allocation4], 1 }

</bundles_post_ra>
